<compile_context>
chip_gen: v7x
topology: tpu7x:2x2x1
jax: 0.10.0
libtpu: 0.0.40
codegen_flags: <defaults>
</compile_context>

<pallas_src>
import functools

import jax
import jax.numpy as jnp
from jax.experimental import pallas as pl
from jax.experimental.pallas import tpu as pltpu

NEG_INF = float("-inf")


def _attention_pooling_kernel(T, tT, use_cache, has_tail,
                              x_ref, w0t_ref, b0_ref, w1t_ref, b1_ref,
                              o_ref,
                              xmax_ref, k_ref, m_ref, l_ref, acc_ref,
                              *maybe_cache):
    xcache_ref = maybe_cache[0] if use_cache else None
    phase = pl.program_id(1)   # 0: running max over T (+cache fill); 1: pooling
    t = pl.program_id(2)
    n_t = pl.num_programs(2)

    # ------------- phase 0: per-channel running max over T (+ VMEM cache) -------------
    @pl.when(phase == 0)
    def _():
        @pl.when(t == 0)
        def _():
            xmax_ref[...] = jnp.full_like(xmax_ref, NEG_INF)

        x_raw = x_ref[0]                                   # (tT, D), x dtype
        x = x_raw.astype(jnp.float32)

        if use_cache:
            off = pl.multiple_of(t * tT, tT)
            xcache_ref[pl.ds(off, tT), :] = x_raw          # fill single-pass cache

        def update_max(xm):
            xmax_ref[...] = jnp.maximum(xmax_ref[...],
                                        jnp.max(xm, axis=0, keepdims=True))

        if has_tail:
            # Masking only on the last (ragged) tile; aligned tiles stay unmasked.
            @pl.when(t < n_t - 1)
            def _():
                update_max(x)

            @pl.when(t == n_t - 1)
            def _():
                row_ok = (t * tT +
                          jax.lax.broadcasted_iota(jnp.int32, (tT, 1), 0)) < T
                update_max(jnp.where(row_ok, x, NEG_INF))
        else:
            update_max(x)

    # ---------- phase 1: k = ResnetBlockFC(x_max); online-softmax pooling ----------
    @pl.when(phase == 1)
    def _():
        @pl.when(t == 0)
        def _():
            xmax = xmax_ref[...]                           # (1, D)
            net = jnp.dot(jnp.maximum(xmax, 0.0), w0t_ref[...],
                          preferred_element_type=jnp.float32) + b0_ref[...]
            dx = jnp.dot(jnp.maximum(net, 0.0), w1t_ref[...],
                         preferred_element_type=jnp.float32) + b1_ref[...]
            k_ref[...] = xmax + dx                         # shortcut = identity
            m_ref[...] = jnp.full_like(m_ref, NEG_INF)
            l_ref[...] = jnp.zeros_like(l_ref)
            acc_ref[...] = jnp.zeros_like(acc_ref)

        if use_cache:
            off = pl.multiple_of(t * tT, tT)
            x = xcache_ref[pl.ds(off, tT), :].astype(jnp.float32)   # no HBM DMA
        else:
            x = x_ref[0].astype(jnp.float32)                        # re-streamed

        def online_step(xv, col_mask=None):
            # alpha_t = <k, x_t>  ->  (1, tT), contraction on the MXU.
            alpha = jax.lax.dot_general(k_ref[...], xv,
                                        (((1,), (1,)), ((), ())),
                                        preferred_element_type=jnp.float32)
            if col_mask is not None:
                alpha = jnp.where(col_mask, alpha, NEG_INF)
            m_prev = m_ref[...]                            # (1, 1)
            m_new = jnp.maximum(m_prev, jnp.max(alpha, axis=-1, keepdims=True))
            corr = jnp.exp(m_prev - m_new)
            p = jnp.exp(alpha - m_new)                     # (1, tT)
            l_ref[...] = corr * l_ref[...] + jnp.sum(p, axis=-1, keepdims=True)
            acc_ref[...] = corr * acc_ref[...] + jnp.dot(
                p, xv, preferred_element_type=jnp.float32)  # (1, D)
            m_ref[...] = m_new

        if has_tail:
            @pl.when(t < n_t - 1)
            def _():
                online_step(x)

            @pl.when(t == n_t - 1)
            def _():
                row_ok = (t * tT +
                          jax.lax.broadcasted_iota(jnp.int32, (tT, 1), 0)) < T
                col_ok = (t * tT +
                          jax.lax.broadcasted_iota(jnp.int32, (1, tT), 1)) < T
                online_step(jnp.where(row_ok, x, 0.0), col_ok)
        else:
            online_step(x)

        @pl.when(t == n_t - 1)
        def _():
            o_ref[0] = (acc_ref[...] / l_ref[...]).astype(o_ref.dtype)


def attention_pooling(x, params, *, keepdim=True, block_t=2048,
                      cache_budget_bytes=24 << 20):
    """AttentionPooling forward.  x: (B, T, dim) -> (B, 1, dim) (or (B, dim))."""
    B, T, D = x.shape
    assert T >= 1, "T must be >= 1"
    w0, b0 = params["fc0_w"], params["fc0_b"]      # (D, D), (D,)
    w1, b1 = params["fc1_w"], params["fc1_b"]      # (D, D), (D,)

    tT = T if T <= block_t else block_t
    assert tT == T or tT % 8 == 0, "row tile must be a multiple of 8"
    n_t = pl.cdiv(T, tT)
    has_tail = (T % tT) != 0

    x_item = jnp.dtype(x.dtype).itemsize
    cache_bytes = n_t * tT * D * x_item
    # Single-pass VMEM cache of x between phases (only useful for > 1 tile);
    # 24 MiB budget leaves headroom on v7x's 64 MiB physical VMEM.
    use_cache = (n_t > 1) and (cache_bytes <= cache_budget_bytes)

    if use_cache:
        # Phase 1 keeps revisiting phase-0's last block -> Pallas skips all
        # phase-1 x DMAs; x is read from the VMEM cache instead.
        x_index = lambda b, p, t: (b, (1 - p) * t + p * (n_t - 1), 0)
    else:
        x_index = lambda b, p, t: (b, t, 0)

    scratch = [
        pltpu.VMEM((1, D), jnp.float32),    # running channel max over T
        pltpu.VMEM((1, D), jnp.float32),    # k = ResnetBlockFC(x_max)
        pltpu.VMEM((1, 1), jnp.float32),    # online-softmax running max
        pltpu.VMEM((1, 1), jnp.float32),    # online-softmax denominator
        pltpu.VMEM((1, D), jnp.float32),    # weighted-sum accumulator
    ]
    if use_cache:
        scratch.append(pltpu.VMEM((n_t * tT, D), x.dtype))   # x cache (1 HBM pass)

    # Explicit VMEM budget: cache + (double-buffered) x tiles + weights + slack,
    # clamped to a limit that is legal on every generation (v7x: 64 MiB physical).
    tile_bytes = tT * D * x_item
    weight_bytes = 2 * (D * D + D) * 4
    vmem_needed = ((cache_bytes if use_cache else 0) + 3 * tile_bytes
                   + 2 * weight_bytes + 8 * D * 4 + (1 << 20))
    vmem_limit = int(min(64 << 20, max(32 << 20, vmem_needed)))

    hbm_x_bytes = B * T * D * x_item * (1 if use_cache else 2)
    cost = pl.CostEstimate(
        flops=int(B * (4 * T * D + 4 * D * D + 4 * T)),
        transcendentals=int(B * T),
        bytes_accessed=int(hbm_x_bytes + B * D * x_item + 2 * (D * D + D) * 4),
    )

    kernel = functools.partial(_attention_pooling_kernel, T, tT, use_cache, has_tail)
    out = pl.pallas_call(
        kernel,
        out_shape=jax.ShapeDtypeStruct((B, 1, D), x.dtype),
        grid_spec=pltpu.PrefetchScalarGridSpec(
            num_scalar_prefetch=0,
            grid=(B, 2, n_t),                       # (batch, phase, row tiles)
            in_specs=[
                pl.BlockSpec((1, tT, D), x_index),                     # x (streamed)
                pl.BlockSpec((D, D), lambda b, p, t: (0, 0)),          # fc_0 W^T
                pl.BlockSpec((1, D), lambda b, p, t: (0, 0)),          # fc_0 b
                pl.BlockSpec((D, D), lambda b, p, t: (0, 0)),          # fc_1 W^T
                pl.BlockSpec((1, D), lambda b, p, t: (0, 0)),          # fc_1 b
            ],
            out_specs=pl.BlockSpec((1, 1, D), lambda b, p, t: (b, 0, 0)),
            scratch_shapes=scratch),
        compiler_params=pltpu.CompilerParams(
            dimension_semantics=("parallel", "arbitrary", "arbitrary"),
            vmem_limit_bytes=vmem_limit),
        cost_estimate=cost,
    )(x, w0.T, b0.reshape(1, D), w1.T, b1.reshape(1, D))
    return out if keepdim else out.reshape(B, D)


def init_params(key, dim, dtype=jnp.float32):
    """Params of AttentionPooling.K = ResnetBlockFC(dim, dim, dim) mirroring PyTorch
    Linear default init plus nn.init.zeros_(fc_1.weight)."""
    k0, k1, k2 = jax.random.split(key, 3)
    lim = 1.0 / (dim ** 0.5)
    return {
        "fc0_w": jax.random.uniform(k0, (dim, dim), dtype, -lim, lim),
        "fc0_b": jax.random.uniform(k1, (dim,), dtype, -lim, lim),
        "fc1_w": jnp.zeros((dim, dim), dtype),       # nn.init.zeros_(fc_1.weight)
        "fc1_b": jax.random.uniform(k2, (dim,), dtype, -lim, lim),
    }


def reference(x, params, keepdim=True):
    """Pure-JAX reference matching AttentionPooling.forward (f32 math)."""
    hi = jax.lax.Precision.HIGHEST
    x = x.astype(jnp.float32)
    xm = jnp.max(x, axis=1, keepdims=True)                                  # (B,1,D)
    net = jnp.matmul(jnp.maximum(xm, 0.0), params["fc0_w"].T, precision=hi) \
        + params["fc0_b"]
    dx = jnp.matmul(jnp.maximum(net, 0.0), params["fc1_w"].T, precision=hi) \
        + params["fc1_b"]
    k = xm + dx                                                             # shortcut: identity
    alpha = jnp.sum(k * x, axis=-1, keepdims=True)                          # (B,T,1)
    w = jax.nn.softmax(alpha, axis=1)
    return jnp.sum(w * x, axis=1, keepdims=keepdim)


if __name__ == "__main__":
    key = jax.random.PRNGKey(0)
    kx, kp, kw, kx2 = jax.random.split(key, 4)

    B, T, dim = 2, 256, 128                      # dim = 128 -> lane-dense channels
    x = jax.random.normal(kx, (B, T, dim), jnp.float32)
    params = init_params(kp, dim)

    # 1) Default init (fc_1.weight == 0), single-tile path.
    out = attention_pooling(x, params)
    jax.block_until_ready(out)
    ref = reference(x, params)
    assert out.shape == (B, 1, dim), out.shape
    assert jnp.allclose(out, ref, atol=1e-4, rtol=1e-3), \
        float(jnp.max(jnp.abs(out - ref)))

    # 2) Nonzero fc_1 weights exercise the full fc_0 -> fc_1 path in-kernel.
    params_nz = dict(params)
    params_nz["fc1_w"] = 0.05 * jax.random.normal(kw, (dim, dim), jnp.float32)
    out_nz = attention_pooling(x, params_nz)
    ref_nz = reference(x, params_nz)
    assert jnp.allclose(out_nz, ref_nz, atol=1e-4, rtol=1e-3), \
        float(jnp.max(jnp.abs(out_nz - ref_nz)))

    # 3) Ragged T, multi-tile, single-pass VMEM cache + masked tail tile.
    T2 = 200
    x2 = jax.random.normal(kx2, (B, T2, dim), jnp.float32)
    out2 = attention_pooling(x2, params_nz, block_t=128)
    ref2 = reference(x2, params_nz)
    assert out2.shape == (B, 1, dim), out2.shape
    assert jnp.allclose(out2, ref2, atol=1e-4, rtol=1e-3), \
        float(jnp.max(jnp.abs(out2 - ref2)))

    # 4) Same ragged case with the cache disabled -> 2-pass streaming fallback.
    out2s = attention_pooling(x2, params_nz, block_t=128, cache_budget_bytes=0)
    assert jnp.allclose(out2s, ref2, atol=1e-4, rtol=1e-3), \
        float(jnp.max(jnp.abs(out2s - ref2)))

    # 5) bf16 streaming path (HBM bytes halved); stats/accumulators stay f32.
    x_bf16 = x.astype(jnp.bfloat16)
    out_bf = attention_pooling(x_bf16, params_nz)
    ref_bf = reference(x_bf16, params_nz)
    assert out_bf.dtype == jnp.bfloat16
    assert jnp.allclose(out_bf.astype(jnp.float32), ref_bf, atol=3e-2, rtol=3e-2), \
        float(jnp.max(jnp.abs(out_bf.astype(jnp.float32) - ref_bf)))

    jax.block_until_ready((out, out_nz, out2, out2s, out_bf))
    print("KERNEL_OK")
</pallas_src>

<mosaic_0001>
module attributes {stable_mosaic.version = 11 : i64} {
  func.func @_attention_pooling_kernel(%arg0: i32, %arg1: i32, %arg2: i32, %arg3: memref<1x256x128xf32, #tpu.memory_space<vmem>>, %arg4: memref<128x128xf32, #tpu.memory_space<vmem>>, %arg5: memref<1x128xf32, #tpu.memory_space<vmem>>, %arg6: memref<128x128xf32, #tpu.memory_space<vmem>>, %arg7: memref<1x128xf32, #tpu.memory_space<vmem>>, %arg8: memref<1x1x128xf32, #tpu.memory_space<vmem>>, %arg9: memref<1x128xf32, #tpu.memory_space<vmem>>, %arg10: memref<1x128xf32, #tpu.memory_space<vmem>>, %arg11: memref<1x1xf32, #tpu.memory_space<vmem>>, %arg12: memref<1x1xf32, #tpu.memory_space<vmem>>, %arg13: memref<1x128xf32, #tpu.memory_space<vmem>>) attributes {dimension_semantics = [#tpu.dimension_semantics<parallel>, #tpu.dimension_semantics<arbitrary>, #tpu.dimension_semantics<arbitrary>], iteration_bounds = array<i64: 2, 2, 1>, scalar_prefetch = 0 : i64, scratch_operands = 5 : i64, tpu.core_type = #tpu.core_type<tc>, window_params = [{transform_indices = @transform_0, window_bounds = array<i64: 1, 256, 128>}, {pipeline_mode = #tpu.pipeline_mode<synchronous>, transform_indices = @transform_1, window_bounds = array<i64: 128, 128>}, {pipeline_mode = #tpu.pipeline_mode<synchronous>, transform_indices = @transform_2, window_bounds = array<i64: 1, 128>}, {pipeline_mode = #tpu.pipeline_mode<synchronous>, transform_indices = @transform_3, window_bounds = array<i64: 128, 128>}, {pipeline_mode = #tpu.pipeline_mode<synchronous>, transform_indices = @transform_4, window_bounds = array<i64: 1, 128>}, {transform_indices = @transform_5, window_bounds = array<i64: 1, 1, 128>}]} {
    %c0_i32 = arith.constant 0 : i32
    %0 = arith.cmpi eq, %arg1, %c0_i32 : i32
    %1 = arith.extui %0 : i1 to i32
    %c0_i32_0 = arith.constant 0 : i32
    %2 = arith.cmpi ne, %1, %c0_i32_0 : i32
    scf.if %2 {
      %c0_i32_2 = arith.constant 0 : i32
      %6 = arith.cmpi eq, %arg2, %c0_i32_2 : i32
      %7 = arith.extui %6 : i1 to i32
      %c0_i32_3 = arith.constant 0 : i32
      %8 = arith.cmpi ne, %7, %c0_i32_3 : i32
      scf.if %8 {
        %cst_10 = arith.constant 0xFF800000 : f32
        %16 = vector.broadcast %cst_10 : f32 to vector<1x128xf32>
        %c0_11 = arith.constant 0 : index
        %c0_12 = arith.constant 0 : index
        %17 = vector.load %arg9[%c0_11, %c0_12] : memref<1x128xf32, #tpu.memory_space<vmem>>, vector<1x128xf32>
        tpu.vector_store %arg9[%c0_11, %c0_12], %16 {strides = array<i32>} : memref<1x128xf32, #tpu.memory_space<vmem>>, vector<1x128xf32>,
      } else {
      }
      %c0 = arith.constant 0 : index
      %c0_4 = arith.constant 0 : index
      %c0_5 = arith.constant 0 : index
      %9 = vector.load %arg3[%c0, %c0_4, %c0_5] : memref<1x256x128xf32, #tpu.memory_space<vmem>>, vector<1x256x128xf32>
      %10 = vector.shape_cast %9 : vector<1x256x128xf32> to vector<256x128xf32>
      %c0_6 = arith.constant 0 : index
      %c0_7 = arith.constant 0 : index
      %11 = vector.load %arg9[%c0_6, %c0_7] : memref<1x128xf32, #tpu.memory_space<vmem>>, vector<1x128xf32>
      %cst = arith.constant dense<0xFF800000> : vector<128xf32>
      %12 = vector.multi_reduction <maximumf>, %10, %cst [0] : vector<256x128xf32> to vector<128xf32>
      %13 = vector.shape_cast %12 : vector<128xf32> to vector<1x128xf32>
      %14 = arith.maximumf %11, %13 : vector<1x128xf32>
      %c0_8 = arith.constant 0 : index
      %c0_9 = arith.constant 0 : index
      %15 = vector.load %arg9[%c0_8, %c0_9] : memref<1x128xf32, #tpu.memory_space<vmem>>, vector<1x128xf32>
      tpu.vector_store %arg9[%c0_8, %c0_9], %14 {strides = array<i32>} : memref<1x128xf32, #tpu.memory_space<vmem>>, vector<1x128xf32>,
    } else {
    }
    %c1_i32 = arith.constant 1 : i32
    %3 = arith.cmpi eq, %arg1, %c1_i32 : i32
    %4 = arith.extui %3 : i1 to i32
    %c0_i32_1 = arith.constant 0 : i32
    %5 = arith.cmpi ne, %4, %c0_i32_1 : i32
    scf.if %5 {
      %c0_i32_2 = arith.constant 0 : i32
      %6 = arith.cmpi eq, %arg2, %c0_i32_2 : i32
      %7 = arith.extui %6 : i1 to i32
      %c0_i32_3 = arith.constant 0 : i32
      %8 = arith.cmpi ne, %7, %c0_i32_3 : i32
      scf.if %8 {
        %c0_25 = arith.constant 0 : index
        %c0_26 = arith.constant 0 : index
        %38 = vector.load %arg9[%c0_25, %c0_26] : memref<1x128xf32, #tpu.memory_space<vmem>>, vector<1x128xf32>
        %cst_27 = arith.constant 0.000000e+00 : f32
        %39 = vector.broadcast %cst_27 : f32 to vector<1x128xf32>
        %40 = arith.maximumf %38, %39 : vector<1x128xf32>
        %c0_28 = arith.constant 0 : index
        %c0_29 = arith.constant 0 : index
        %41 = vector.load %arg4[%c0_28, %c0_29] : memref<128x128xf32, #tpu.memory_space<vmem>>, vector<128x128xf32>
        %cst_30 = arith.constant dense<0.000000e+00> : vector<1x128xf32>
        %42 = tpu.matmul %40, %41, %cst_30 {dimension_numbers = #tpu.dot_dimension_numbers<[1], [0], [0], [1], [0, 0, 1, 1], [], []>} : vector<1x128xf32>, vector<128x128xf32>, vector<1x128xf32> -> vector<1x128xf32>
        %c0_31 = arith.constant 0 : index
        %c0_32 = arith.constant 0 : index
        %43 = vector.load %arg5[%c0_31, %c0_32] : memref<1x128xf32, #tpu.memory_space<vmem>>, vector<1x128xf32>
        %44 = arith.addf %42, %43 : vector<1x128xf32>
        %cst_33 = arith.constant 0.000000e+00 : f32
        %45 = vector.broadcast %cst_33 : f32 to vector<1x128xf32>
        %46 = arith.maximumf %44, %45 : vector<1x128xf32>
        %c0_34 = arith.constant 0 : index
        %c0_35 = arith.constant 0 : index
        %47 = vector.load %arg6[%c0_34, %c0_35] : memref<128x128xf32, #tpu.memory_space<vmem>>, vector<128x128xf32>
        %cst_36 = arith.constant dense<0.000000e+00> : vector<1x128xf32>
        %48 = tpu.matmul %46, %47, %cst_36 {dimension_numbers = #tpu.dot_dimension_numbers<[1], [0], [0], [1], [0, 0, 1, 1], [], []>} : vector<1x128xf32>, vector<128x128xf32>, vector<1x128xf32> -> vector<1x128xf32>
        %c0_37 = arith.constant 0 : index
        %c0_38 = arith.constant 0 : index
        %49 = vector.load %arg7[%c0_37, %c0_38] : memref<1x128xf32, #tpu.memory_space<vmem>>, vector<1x128xf32>
        %50 = arith.addf %48, %49 : vector<1x128xf32>
        %51 = arith.addf %38, %50 : vector<1x128xf32>
        %c0_39 = arith.constant 0 : index
        %c0_40 = arith.constant 0 : index
        %52 = vector.load %arg10[%c0_39, %c0_40] : memref<1x128xf32, #tpu.memory_space<vmem>>, vector<1x128xf32>
        tpu.vector_store %arg10[%c0_39, %c0_40], %51 {strides = array<i32>} : memref<1x128xf32, #tpu.memory_space<vmem>>, vector<1x128xf32>,
        %cst_41 = arith.constant 0xFF800000 : f32
        %53 = vector.broadcast %cst_41 : f32 to vector<1x1xf32>
        %c0_42 = arith.constant 0 : index
        %c0_43 = arith.constant 0 : index
        %54 = vector.load %arg11[%c0_42, %c0_43] : memref<1x1xf32, #tpu.memory_space<vmem>>, vector<1x1xf32>
        tpu.vector_store %arg11[%c0_42, %c0_43], %53 {strides = array<i32>} : memref<1x1xf32, #tpu.memory_space<vmem>>, vector<1x1xf32>,
        %cst_44 = arith.constant 0.000000e+00 : f32
        %55 = vector.broadcast %cst_44 : f32 to vector<1x1xf32>
        %c0_45 = arith.constant 0 : index
        %c0_46 = arith.constant 0 : index
        %56 = vector.load %arg12[%c0_45, %c0_46] : memref<1x1xf32, #tpu.memory_space<vmem>>, vector<1x1xf32>
        tpu.vector_store %arg12[%c0_45, %c0_46], %55 {strides = array<i32>} : memref<1x1xf32, #tpu.memory_space<vmem>>, vector<1x1xf32>,
        %cst_47 = arith.constant 0.000000e+00 : f32
        %57 = vector.broadcast %cst_47 : f32 to vector<1x128xf32>
        %c0_48 = arith.constant 0 : index
        %c0_49 = arith.constant 0 : index
        %58 = vector.load %arg13[%c0_48, %c0_49] : memref<1x128xf32, #tpu.memory_space<vmem>>, vector<1x128xf32>
        tpu.vector_store %arg13[%c0_48, %c0_49], %57 {strides = array<i32>} : memref<1x128xf32, #tpu.memory_space<vmem>>, vector<1x128xf32>,
      } else {
      }
      %c0 = arith.constant 0 : index
      %c0_4 = arith.constant 0 : index
      %c0_5 = arith.constant 0 : index
      %9 = vector.load %arg3[%c0, %c0_4, %c0_5] : memref<1x256x128xf32, #tpu.memory_space<vmem>>, vector<1x256x128xf32>
      %10 = vector.shape_cast %9 : vector<1x256x128xf32> to vector<256x128xf32>
      %c0_6 = arith.constant 0 : index
      %c0_7 = arith.constant 0 : index
      %11 = vector.load %arg10[%c0_6, %c0_7] : memref<1x128xf32, #tpu.memory_space<vmem>>, vector<1x128xf32>
      %cst = arith.constant dense<0.000000e+00> : vector<1x256xf32>
      %12 = tpu.matmul %11, %10, %cst {dimension_numbers = #tpu.dot_dimension_numbers<[1], [1], [0], [0], [0, 0, 1, 0], [], []>} : vector<1x128xf32>, vector<256x128xf32>, vector<1x256xf32> -> vector<1x256xf32>
      %c0_8 = arith.constant 0 : index
      %c0_9 = arith.constant 0 : index
      %13 = vector.load %arg11[%c0_8, %c0_9] : memref<1x1xf32, #tpu.memory_space<vmem>>, vector<1x1xf32>
      %cst_10 = arith.constant dense<0xFF800000> : vector<1xf32>
      %14 = vector.multi_reduction <maximumf>, %12, %cst_10 [1] : vector<1x256xf32> to vector<1xf32>
      %15 = vector.shape_cast %14 : vector<1xf32> to vector<1x1xf32>
      %16 = arith.maximumf %13, %15 : vector<1x1xf32>
      %17 = arith.subf %13, %16 : vector<1x1xf32>
      %18 = math.exp %17 : vector<1x1xf32>
      %19 = vector.broadcast %16 : vector<1x1xf32> to vector<1x256xf32>
      %20 = arith.subf %12, %19 : vector<1x256xf32>
      %21 = math.exp %20 : vector<1x256xf32>
      %c0_11 = arith.constant 0 : index
      %c0_12 = arith.constant 0 : index
      %22 = vector.load %arg12[%c0_11, %c0_12] : memref<1x1xf32, #tpu.memory_space<vmem>>, vector<1x1xf32>
      %23 = arith.mulf %18, %22 : vector<1x1xf32>
      %cst_13 = arith.constant dense<0.000000e+00> : vector<1xf32>
      %24 = vector.multi_reduction <add>, %21, %cst_13 [1] : vector<1x256xf32> to vector<1xf32>
      %25 = vector.shape_cast %24 : vector<1xf32> to vector<1x1xf32>
      %26 = arith.addf %23, %25 : vector<1x1xf32>
      %c0_14 = arith.constant 0 : index
      %c0_15 = arith.constant 0 : index
      %27 = vector.load %arg12[%c0_14, %c0_15] : memref<1x1xf32, #tpu.memory_space<vmem>>, vector<1x1xf32>
      tpu.vector_store %arg12[%c0_14, %c0_15], %26 {strides = array<i32>} : memref<1x1xf32, #tpu.memory_space<vmem>>, vector<1x1xf32>,
      %c0_16 = arith.constant 0 : index
      %c0_17 = arith.constant 0 : index
      %28 = vector.load %arg13[%c0_16, %c0_17] : memref<1x128xf32, #tpu.memory_space<vmem>>, vector<1x128xf32>
      %29 = vector.broadcast %18 : vector<1x1xf32> to vector<1x128xf32>
      %30 = arith.mulf %29, %28 : vector<1x128xf32>
      %cst_18 = arith.constant dense<0.000000e+00> : vector<1x128xf32>
      %31 = tpu.matmul %21, %10, %cst_18 {dimension_numbers = #tpu.dot_dimension_numbers<[1], [0], [0], [1], [0, 0, 1, 1], [], []>} : vector<1x256xf32>, vector<256x128xf32>, vector<1x128xf32> -> vector<1x128xf32>
      %32 = arith.addf %30, %31 : vector<1x128xf32>
      %c0_19 = arith.constant 0 : index
      %c0_20 = arith.constant 0 : index
      %33 = vector.load %arg13[%c0_19, %c0_20] : memref<1x128xf32, #tpu.memory_space<vmem>>, vector<1x128xf32>
      tpu.vector_store %arg13[%c0_19, %c0_20], %32 {strides = array<i32>} : memref<1x128xf32, #tpu.memory_space<vmem>>, vector<1x128xf32>,
      %c0_21 = arith.constant 0 : index
      %c0_22 = arith.constant 0 : index
      %34 = vector.load %arg11[%c0_21, %c0_22] : memref<1x1xf32, #tpu.memory_space<vmem>>, vector<1x1xf32>
      tpu.vector_store %arg11[%c0_21, %c0_22], %16 {strides = array<i32>} : memref<1x1xf32, #tpu.memory_space<vmem>>, vector<1x1xf32>,
      %c0_i32_23 = arith.constant 0 : i32
      %35 = arith.cmpi eq, %arg2, %c0_i32_23 : i32
      %36 = arith.extui %35 : i1 to i32
      %c0_i32_24 = arith.constant 0 : i32
      %37 = arith.cmpi ne, %36, %c0_i32_24 : i32
      scf.if %37 {
        %c0_25 = arith.constant 0 : index
        %c0_26 = arith.constant 0 : index
        %38 = vector.load %arg13[%c0_25, %c0_26] : memref<1x128xf32, #tpu.memory_space<vmem>>, vector<1x128xf32>
        %c0_27 = arith.constant 0 : index
        %c0_28 = arith.constant 0 : index
        %39 = vector.load %arg12[%c0_27, %c0_28] : memref<1x1xf32, #tpu.memory_space<vmem>>, vector<1x1xf32>
        %40 = vector.broadcast %39 : vector<1x1xf32> to vector<1x128xf32>
        %41 = arith.divf %38, %40 : vector<1x128xf32>
        %c0_29 = arith.constant 0 : index
        %c0_30 = arith.constant 0 : index
        %c0_31 = arith.constant 0 : index
        %42 = vector.load %arg8[%c0_29, %c0_30, %c0_31] : memref<1x1x128xf32, #tpu.memory_space<vmem>>, vector<1x1x128xf32>
        %43 = vector.shape_cast %42 : vector<1x1x128xf32> to vector<1x128xf32>
        %44 = vector.shape_cast %41 : vector<1x128xf32> to vector<1x1x128xf32>
        tpu.vector_store %arg8[%c0_29, %c0_30, %c0_31], %44 {strides = array<i32>} : memref<1x1x128xf32, #tpu.memory_space<vmem>>, vector<1x1x128xf32>,
      } else {
      }
    } else {
    }
    return
  }
  func.func @transform_0(%arg0: i32, %arg1: i32, %arg2: i32) -> (i32, i32, i32) {
    %c0_i32 = arith.constant 0 : i32
    %c0_i32_0 = arith.constant 0 : i32
    return %arg0, %arg2, %c0_i32 : i32, i32, i32
  }
  func.func @transform_1(%arg0: i32, %arg1: i32, %arg2: i32) -> (i32, i32) {
    %c0_i32 = arith.constant 0 : i32
    %c0_i32_0 = arith.constant 0 : i32
    %c0_i32_1 = arith.constant 0 : i32
    return %c0_i32, %c0_i32_0 : i32, i32
  }
  func.func @transform_2(%arg0: i32, %arg1: i32, %arg2: i32) -> (i32, i32) {
    %c0_i32 = arith.constant 0 : i32
    %c0_i32_0 = arith.constant 0 : i32
    %c0_i32_1 = arith.constant 0 : i32
    return %c0_i32, %c0_i32_0 : i32, i32
  }
  func.func @transform_3(%arg0: i32, %arg1: i32, %arg2: i32) -> (i32, i32) {
    %c0_i32 = arith.constant 0 : i32
    %c0_i32_0 = arith.constant 0 : i32
    %c0_i32_1 = arith.constant 0 : i32
    return %c0_i32, %c0_i32_0 : i32, i32
  }
  func.func @transform_4(%arg0: i32, %arg1: i32, %arg2: i32) -> (i32, i32) {
    %c0_i32 = arith.constant 0 : i32
    %c0_i32_0 = arith.constant 0 : i32
    %c0_i32_1 = arith.constant 0 : i32
    return %c0_i32, %c0_i32_0 : i32, i32
  }
  func.func @transform_5(%arg0: i32, %arg1: i32, %arg2: i32) -> (i32, i32, i32) {
    %c0_i32 = arith.constant 0 : i32
    %c0_i32_0 = arith.constant 0 : i32
    %c0_i32_1 = arith.constant 0 : i32
    return %arg0, %c0_i32, %c0_i32_0 : i32, i32, i32
  }
}

</mosaic_0001>

<bundles_post_ra>
// kernel: tpu_custom_call.1
= control target key start
LH: loop header
LB: loop body
LE: loop exit
PB: predicated region body
PF: predicated region fallthrough
CT: control target
= control target key end

     0   :  { %s1954_s0 = inlined_call_operand.hbm [shape: f32[2,256,128], index: 0, kind: input, shape index: {}]   ;;  %s1955_s1 = inlined_call_operand.hbm [shape: f32[128,128], index: 1, kind: input, shape index: {}]   ;;  %s1956_s2 = inlined_call_operand.vmem [shape: f32[1,128], index: 2, kind: input, shape index: {}]   ;;  %s1957_s3 = inlined_call_operand.hbm [shape: f32[128,128], index: 3, kind: input, shape index: {}]   ;;  %s1958_s4 = inlined_call_operand.vmem [shape: f32[1,128], index: 4, kind: input, shape index: {}]   ;;  %s1959_s5 = inlined_call_operand.hbm [shape: f32[2,1,128], index: 5, kind: output, shape index: {}]  }
   0x1   :  { %1968 = sst [smem:[#allocation19_spill]] %s1955_s1 }
   0x2   :  { %10 = vsyncpa [#allocation8], 0 }
   0x3   :  { %12 = vsyncpa [#allocation8 + $0x1], 0 }
   0x4   :  { %13 = vsyncpa [#allocation11], 0 }
   0x5   :  { %14 = vsyncpa [#allocation9], 0 }
   0x6   :  { %16 = vsyncpa [#allocation9 + $0x1], 0  ;;  %s1576_s18 = smov 0   ;;  %s1578_s19 = smov 0  }
   0x7   :  { %s1580_s20 = smov 0   ;;  %s1582_s21 = smov 0  }
   0x8   :  { %s1584_s22 = smov 0   ;;  %s1586_s23 = smov 0  }
   0x9   :  { %s1588_s24 = smov 0   ;;  %s1590_s25 = smov 0  }
   0xa LB: > { %1969 = sst [smem:[#allocation17_spill]] %s1504_s18  ;;  %s923_s26 = sadd.s32 4294967295, %s1532_s25   ;;  %s1532_s25 = sphi %s1590_s25, %s22_s25   ;;  %s1528_s24 = sphi %s1588_s24, %s1996_s24   ;;  %s1524_s23 = sphi %s1586_s23, %s1995_s23   ;;  %s1520_s22 = sphi %s1584_s22, %s1994_s22   ;;  %s1516_s21 = sphi %s1582_s21, %s1993_s21   ;;  %s1512_s20 = sphi %s1580_s20, %s1992_s20   ;;  %s1508_s19 = sphi %s1578_s19, %s1991_s19   ;;  %s1504_s18 = sphi %s1576_s18, %s1990_s18  }
   0xb   : > { %s924_s27 = sadd.s32 4294967294, %s1532_s25   ;;  %p63_p0 = scmp.ne.s32.totalorder %s1508_s19, %s1504_s18 }
   0xc   : > { %p1620_p1 = scmp.eq.s32.totalorder %s923_s26, 0  ;;  %p1624_p2 = scmp.eq.s32.totalorder %s923_s26, 3 }
   0xd   : > { %p177_p3 = scmp.eq.s32.totalorder %s924_s27, 3  ;;  %p925_p5 = scmp.ge.s32.totalorder %s1532_s25, 1 }
   0xe   : > { %s1970_s28 = scalar_select %p1620_p1, 1, 0 }
   0xf   : > { %s1971_s29 = scalar_select %p1624_p2, 1, 0 }
  0x10   : > { %p1630_p4 = por %p1620_p1, %p63_p0  ;;  %p1635_p6 = por %p177_p3, %p63_p0 }
  0x11   : > { %p184_p7 = scmp.lt.s32.totalorder %s1532_s25, 5  ;;  %s1534_s8 = smov [#allocation10]  }
  0x12   : > { %s1972_s30 = scalar_select %p1630_p4, 1, 0 }
  0x13   : > { %s1973_s6 = scalar_select %p1635_p6, 1, 0 }
  0x14   : > { %p1640_p8 = pnand %p925_p5, %p184_p7  ;;  %s196_s9 = sshll.u32 %s1534_s8, 4  ;;  %s197_s9 = int_to_ptr.vmem [resolvable:$true] %s196_s9 }
  0x15   : > { %1974 = sst [smem:[#allocation18_spill]] %s1973_s6  ;;  %s1535_s11 = smov [#allocation12]  }
  0x16   : > { %s1975_s7 = scalar_select %p1640_p8, 1, 0 }
  0x17   : > { %p1239_p9 = pneg %p1640_p8  ;;  %s212_s12 = sshll.u32 %s1535_s11, 4  ;;  %s1652_s12 = int_to_ptr.vmem [resolvable:$true] %s212_s12 }
  0x18   : > { %s1977_s1 = sld [smem:[#allocation19_spill]] }
  0x19   : > { %p1648_p10 = pnand %p1239_p9, %p1620_p1 }
  0x1b   : > { %p1346_p12 = pneg %p1648_p10 }
  0x1e   : > { %s1344_s15 = scalar_lea.hbm %s1977_s1, 2048 }
  0x1f   : > { %p1345_p11 = scmp.ne.s32.totalorder %s1977_s1, %s1344_s15  ;;  %p1351_p3 = scmp.lt.u32.totalorder %s1344_s15, %s1977_s1 }
  0x21   : > { %p1347_p13 = pnand %p1346_p12, %p1345_p11 }
  0x23   : > { %p1348_p0 = pneg %p1347_p13 }
  0x25   : > { %p1353_p5 = pnand %p1351_p3, %p1348_p0 }
  0x27   : > { %1356 = shalt.err (!%p1353_p5)
}
  0x28   : > { %s1357_s8 = scalar_lea.vmem %s197_s9, 2048  ;;  %p1365_p1 = scmp.lt.s32.totalorder %s197_s9, %s197_s9 }
  0x29   : > { %p1358_p7 = scmp.ne.s32.totalorder %s197_s9, %s1357_s8  ;;  %p1366_p4 = scmp.lt.s32.totalorder %s1357_s8, %s1357_s8 }
  0x2b   : > { %p1360_p9 = pnand %p1358_p7, %p1346_p12  ;;  %p1367_p8 = por %p1366_p4, %p1365_p1 }
  0x2d   : > { %p1361_p6 = pneg %p1360_p9 }
  0x2f   : > { %p1368_p2 = pnand %p1367_p8, %p1361_p6 }
  0x31   : > { %1371 = shalt.err (!%p1368_p2)
}
  0x32   : > { %s1966_s11 = smov 128   ;;  %s1967_s13 = smov 8  }
  0x33   : > { %1242 = dma.hbm_to_vmem [thread:$0]  (!%p1648_p10), %s1977_s1, 2048, %s197_s9, [#allocation11], %s1966_s11, %s1966_s11, %s1967_s13  }
  0x34   : > { %s1372_s26 = scalar_lea.hbm %s1957_s3, 2048 }
  0x35   : > { %p1373_p1 = scmp.ne.s32.totalorder %s1957_s3, %s1372_s26  ;;  %p1379_p6 = scmp.lt.u32.totalorder %s1372_s26, %s1957_s3 }
  0x37   : > { %p1375_p2 = pnand %p1373_p1, %p1346_p12 }
  0x39   : > { %p1376_p4 = pneg %p1375_p2 }
  0x3b   : > { %p1381_p8 = pnand %p1379_p6, %p1376_p4 }
  0x3d   : > { %1384 = shalt.err (!%p1381_p8)
}
  0x3e   : > { %s1385_s9 = scalar_lea.vmem %s1652_s12, 2048  ;;  %p1393_p3 = scmp.lt.s32.totalorder %s1652_s12, %s1652_s12 }
  0x3f   : > { %p1386_p11 = scmp.ne.s32.totalorder %s1652_s12, %s1385_s9  ;;  %p1394_p5 = scmp.lt.s32.totalorder %s1385_s9, %s1385_s9 }
  0x41   : > { %p1388_p13 = pnand %p1386_p11, %p1346_p12  ;;  %p1395_p7 = por %p1394_p5, %p1393_p3 }
  0x43   : > { %p1389_p0 = pneg %p1388_p13 }
  0x45   : > { %p1396_p9 = pnand %p1395_p7, %p1389_p0 }
  0x47   : > { %1399 = shalt.err (!%p1396_p9)
}
  0x48   : > { %1245 = dma.hbm_to_vmem [thread:$0]  (!%p1648_p10), %s1957_s3, 2048, %s1652_s12, [#allocation11], %s1966_s11, %s1966_s11, %s1967_s13  }
  0x49   : > { %s37_s10 = sadd.s32 1, %s1524_s23  ;;  %s41_s14 = sadd.s32 1, %s1528_s24 }
  0x4a   : > { %p39_p12 = scmp.ge.s32.totalorder %s37_s10, 2  ;;  %s50_s15 = sadd.s32 1, %s1512_s20 }
  0x4b   : > { %p57_p1 = scmp.ne.s32.totalorder %s1512_s20, %s1508_s19  ;;  %p58_p2 = scmp.eq.s32.totalorder %s1532_s25, 0 }
  0x4c   : > { %s1998_s10 = smov (%p39_p12, %s37_s10), 0  ;;  %s2000_s14 = smov (!%p39_p12, %s41_s14), %s1528_s24 }
  0x4d   : > { %p1716_p4 = por %p58_p2, %p57_p1  ;;  %p1979_p6 = scmp.ne.s32.totalorder %s1971_s29, 0 }
  0x4e   : > { %p43_p10 = scmp.ge.s32.totalorder %s2000_s14, 2  ;;  %p1256_p11 = scmp.lt.s32.totalorder %s1532_s25, 4 }
  0x4f   : > { %p1722_p8 = por %p1979_p6, %p57_p1  ;;  %s229_s12 = sand.u32 1, %s1512_s20  }
  0x50   : > { %s941_s26 = sshll.u32 %s1528_s24, 12  ;;  %s2002_s14 = smov (%p43_p10, %s2000_s14), 0 }
  0x51   : > { %s929_s27 = sshll.u32 %s229_s12, 8  ;;  %s45_s8 = ssub.s32 %s1528_s24, %s2002_s14 }
  0x52   : > { %p48_p13 = scmp.eq.s32.totalorder %s45_s8, 0  ;;  %s1736_s6 = scalar_lea.hbm %s1954_s0, %s941_s26 }
  0x53   : > { %s233_s29 = scalar_lea.vmem [#allocation7], %s929_s27  ;;  %p1740_p0 = pnand %p1256_p11, %p1716_p4 }
  0x54   : > { %s242_s11 = sshll.u32 %s233_s29, 4  ;;  %s1749_s8 = scalar_lea.sflag [#allocation8], %s229_s12  ;;  %s1747_s11 = int_to_ptr.vmem [resolvable:$true] %s242_s11 }
  0x55   : > { %s1745_s1 = scalar_select %p48_p13, %s1512_s20, %s50_s15  }
  0x56   : > { %s1400_s26 = scalar_lea.hbm %s1736_s6, 4096  ;;  %p1402_p5 = pneg %p1740_p0 }
  0x57   : > { %p1401_p3 = scmp.ne.s32.totalorder %s1736_s6, %s1400_s26  ;;  %s1405_s9 = scalar_lea.hbm %s1954_s0, 8192 }
  0x58   : > { %p1406_p12 = scmp.lt.u32.totalorder %s1736_s6, %s1954_s0  ;;  %p1407_p1 = scmp.lt.u32.totalorder %s1405_s9, %s1400_s26 }
  0x59   : > { %p1403_p7 = pnand %p1402_p5, %p1401_p3  ;;  %p1409_p4 = scmp.lt.u32.totalorder %s1400_s26, %s1736_s6 }
  0x5a   : > { %p1408_p2 = por %p1407_p1, %p1406_p12 }
  0x5b   : > { %p1404_p9 = pneg %p1403_p7 }
  0x5c   : > { %p1410_p6 = por %p1409_p4, %p1408_p2 }
  0x5e   : > { %p1411_p10 = pnand %p1410_p6, %p1404_p9 }
  0x60   : > { %1414 = shalt.err (!%p1411_p10)
}
  0x61   : > { %s1415_s15 = scalar_lea.vmem %s1747_s11, 4096  ;;  %s1538_s12 = smov [#allocation7]  }
  0x62   : > { %p1416_p11 = scmp.ne.s32.totalorder %s1747_s11, %s1415_s15  ;;  %s1420_s16 = sshll.u32 %s1538_s12, 4  ;;  %s1421_s16 = int_to_ptr.vmem [resolvable:$false] %s1420_s16 }
  0x63   : > { %s1422_s27 = scalar_lea.vmem %s1421_s16, 8192  ;;  %p1423_p7 = scmp.lt.s32.totalorder %s1747_s11, %s1421_s16 }
  0x64   : > { %p1418_p13 = pnand %p1416_p11, %p1402_p5  ;;  %p1424_p12 = scmp.lt.s32.totalorder %s1422_s27, %s1415_s15 }
  0x66   : > { %p1419_p3 = pneg %p1418_p13  ;;  %p1425_p1 = por %p1424_p12, %p1423_p7 }
  0x68   : > { %p1426_p2 = pnand %p1425_p1, %p1419_p3 }
  0x6a   : > { %1429 = shalt.err (!%p1426_p2)
}
  0x6b   : > { %s1982_s26 = smov 8   ;;  %s1983_s9 = smov 128  }
  0x6c   : > { %1249 = dma.hbm_to_vmem [thread:$0]  (!%p1740_p0), %s1736_s6, 4096, %s1747_s11, %s1749_s8, %s1983_s9, %s1983_s9, %s1982_s26  }
  0x6d   : > { %p1984_p5 = scmp.ne.s32.totalorder %s1975_s7, 0 }
  0x6e   : > { %s1783_s18 = sand.u32 (!%p1984_p5), 1, %s1508_s19   ;;  %p1985_p9 = scmp.ne.s32.totalorder (!%p1984_p5), %s1972_s30, 0 }
  0x6f   : > { %254 = sbr.rel (%p1984_p5) target bundleno = 1464 (0x5b8), region = 40  ;;  %s933_s29 = sshll.u32 (!%p1984_p5), %s1783_s18, 8 }
  0x70   : > { %s257_s15 = scalar_lea.sflag (!%p1984_p5), [#allocation8], %s1783_s18  ;;  %s1787_s12 = scalar_lea.vmem (!%p1984_p5), [#allocation7], %s933_s29 }
  0x76   : > { %1491 = dma.done.wait (%p1985_p9), %s257_s15, 4096  }
  0x77   : > { %1493 = vsyncadd (%p1985_p9), %s257_s15, 4294963200  ;;  %p1986_p0 = scmp.ne.s32.totalorder %s1970_s28, 0 }
  0x79   : > { %1495 = dma.done.wait (%p1986_p0), [#allocation11], 4096  }
  0x7a   : > { %1497 = vsyncadd (%p1986_p0), [#allocation11], 4294963200  ;;  %s293_s7 = scalar_lea.vmem [#allocation13], %s1783_s18  ;;  %p936_p4 = scmp.ne.s32.totalorder %s1516_s21, 0 }
  0x7b   : > { %v304_v0 = vld [vmem:[%s1787_s12] sm:$0xff] (!%p936_p4)  ;;  %v305_v1 = vld [vmem:[%s1787_s12 + $0x8] sm:$0xff] (!%p936_p4)  ;;  %v306_v2 = vld [vmem:[%s1787_s12 + $0x10] sm:$0xff] (!%p936_p4)  ;;  %v1539_v3 = vmov (!%p936_p4), -inf  }
  0x7c   : > { %298 = sbr.rel (%p936_p4) target bundleno = 159 (0x9f), region = 56  ;;  %303 = vst [vmem:[#allocation2] sm:$0x1] (!%p936_p4), %v1539_v3  ;;  %v307_v4 = vld [vmem:[%s1787_s12 + $0x18] sm:$0xff] (!%p936_p4)  ;;  %v308_v5 = vld [vmem:[%s1787_s12 + $0x20] sm:$0xff] (!%p936_p4)  ;;  %v309_v6 = vld [vmem:[%s1787_s12 + $0x28] sm:$0xff] (!%p936_p4) }
  0x7d   : > { %v310_v7 = vld [vmem:[%s1787_s12 + $0x30] sm:$0xff] (!%p936_p4)  ;;  %v311_v8 = vld [vmem:[%s1787_s12 + $0x38] sm:$0xff] (!%p936_p4)  ;;  %v312_v9 = vld [vmem:[%s1787_s12 + $0x40] sm:$0xff] (!%p936_p4)  ;;  %v337_v10 = vmax.f32 (!%p936_p4), %v304_v0, %v308_v5  ;;  %v338_v11 = vmax.f32 (!%p936_p4), %v305_v1, %v309_v6 }
  0x7e   : > { %v313_v12 = vld [vmem:[%s1787_s12 + $0x48] sm:$0xff] (!%p936_p4)  ;;  %v314_v13 = vld [vmem:[%s1787_s12 + $0x50] sm:$0xff] (!%p936_p4)  ;;  %v315_v14 = vld [vmem:[%s1787_s12 + $0x58] sm:$0xff] (!%p936_p4)  ;;  %v339_v15 = vmax.f32 (!%p936_p4), %v306_v2, %v310_v7  ;;  %v340_v16 = vmax.f32 (!%p936_p4), %v307_v4, %v311_v8 }
  0x7f   : > { %v316_v17 = vld [vmem:[%s1787_s12 + $0x60] sm:$0xff] (!%p936_p4)  ;;  %v317_v18 = vld [vmem:[%s1787_s12 + $0x68] sm:$0xff] (!%p936_p4)  ;;  %v318_v19 = vld [vmem:[%s1787_s12 + $0x70] sm:$0xff] (!%p936_p4)  ;;  %v341_v20 = vmax.f32 (!%p936_p4), %v337_v10, %v312_v9  ;;  %v342_v21 = vmax.f32 (!%p936_p4), %v338_v11, %v313_v12 }
  0x80   : > { %v319_v22 = vld [vmem:[%s1787_s12 + $0x78] sm:$0xff] (!%p936_p4)  ;;  %v320_v23 = vld [vmem:[%s1787_s12 + $0x80] sm:$0xff] (!%p936_p4)  ;;  %v321_v24 = vld [vmem:[%s1787_s12 + $0x88] sm:$0xff] (!%p936_p4)  ;;  %v343_v25 = vmax.f32 (!%p936_p4), %v339_v15, %v314_v13  ;;  %v344_v26 = vmax.f32 (!%p936_p4), %v340_v16, %v315_v14 }
  0x81   : > { %v322_v27 = vld [vmem:[%s1787_s12 + $0x90] sm:$0xff] (!%p936_p4)  ;;  %v323_v28 = vld [vmem:[%s1787_s12 + $0x98] sm:$0xff] (!%p936_p4)  ;;  %v345_v29 = vmax.f32 (!%p936_p4), %v341_v20, %v316_v17  ;;  %v346_v30 = vmax.f32 (!%p936_p4), %v342_v21, %v317_v18  ;;  %v324_v31 = vld [vmem:[%s1787_s12 + $0xa0] sm:$0xff] (!%p936_p4) }
  0x82   : > { %v325_v32 = vld [vmem:[%s1787_s12 + $0xa8] sm:$0xff] (!%p936_p4)  ;;  %v347_v33 = vmax.f32 (!%p936_p4), %v343_v25, %v318_v19  ;;  %v348_v34 = vmax.f32 (!%p936_p4), %v344_v26, %v319_v22  ;;  %v326_v35 = vld [vmem:[%s1787_s12 + $0xb0] sm:$0xff] (!%p936_p4)  ;;  %v327_v36 = vld [vmem:[%s1787_s12 + $0xb8] sm:$0xff] (!%p936_p4) }
  0x83   : > { %v349_v37 = vmax.f32 %v345_v29, %v320_v23  ;;  %v350_v38 = vmax.f32 %v346_v30, %v321_v24  ;;  %v328_v39 = vld [vmem:[%s1787_s12 + $0xc0] sm:$0xff]  ;;  %v329_v40 = vld [vmem:[%s1787_s12 + $0xc8] sm:$0xff]  ;;  %v330_v43 = vld [vmem:[%s1787_s12 + $0xd0] sm:$0xff] }
  0x84   : > { %v351_v41 = vmax.f32 %v347_v33, %v322_v27  ;;  %v352_v42 = vmax.f32 %v348_v34, %v323_v28  ;;  %v331_v44 = vld [vmem:[%s1787_s12 + $0xd8] sm:$0xff]  ;;  %v332_v47 = vld [vmem:[%s1787_s12 + $0xe0] sm:$0xff]  ;;  %v333_v48 = vld [vmem:[%s1787_s12 + $0xe8] sm:$0xff] }
  0x85   : > { %v353_v45 = vmax.f32 %v349_v37, %v324_v31  ;;  %v354_v46 = vmax.f32 %v350_v38, %v325_v32  ;;  %v334_v51 = vld [vmem:[%s1787_s12 + $0xf0] sm:$0xff]  ;;  %v335_v52 = vld [vmem:[%s1787_s12 + $0xf8] sm:$0xff] }
  0x86   : > { %v355_v49 = vmax.f32 %v351_v41, %v326_v35  ;;  %v356_v50 = vmax.f32 %v352_v42, %v327_v36  ;;  %v336_v5 = vld [vmem:[#allocation2] sm:$0x1] }
  0x87   : > { %v357_v53 = vmax.f32 %v353_v45, %v328_v39  ;;  %v358_v54 = vmax.f32 %v354_v46, %v329_v40 }
  0x88   : > { %v359_v55 = vmax.f32 %v355_v49, %v330_v43  ;;  %v360_v56 = vmax.f32 %v356_v50, %v331_v44 }
  0x89   : > { %v361_v57 = vmax.f32 %v357_v53, %v332_v47  ;;  %v362_v58 = vmax.f32 %v358_v54, %v333_v48 }
  0x8a   : > { %v363_v59 = vmax.f32 %v359_v55, %v334_v51  ;;  %v364_v60 = vmax.f32 %v360_v56, %v335_v52 }
  0x8b   : > { %v365_v61 = vmax.f32 %v361_v57, %v362_v58 }
  0x8c   : > { %v366_v62 = vmax.f32 %v363_v59, %v364_v60 }
  0x8e   : > { %v367_v63 = vmax.f32 %v365_v61, %v366_v62 }
  0x90   : > { %v368_v0 = vrot.slane %v367_v63, 4 }
  0x92   : > { %v369_v1 = vmax.f32 %v367_v63, %v368_v0 }
  0x94   : > { %v370_v2 = vrot.slane %v369_v1, 2 }
  0x96   : > { %v371_v3 = vmax.f32 %v369_v1, %v370_v2 }
  0x98   : > { %v372_v4 = vrot.slane %v371_v3, 1 }
  0x9a   : > { %v373_v6 = vmax.f32 %v371_v3, %v372_v4 }
  0x9c   : > { %v374_v7 = vmax.f32 %v336_v5, %v373_v6 }
  0x9e   : > { %375 = vst [vmem:[#allocation2] sm:$0x1] %v374_v7 }
  0x9f PF: > { %p937_p6 = scmp.ne.s32.totalorder %s1516_s21, 1 }
  0xa0   : > { %v386_v8 = vld [vmem:[#allocation10] sm:$0xff] (!%p937_p6)  ;;  %v387_v9 = vld [vmem:[#allocation10 + $0x8] sm:$0xff] (!%p937_p6)  ;;  %v388_v10 = vld [vmem:[#allocation10 + $0x10] sm:$0xff] (!%p937_p6)  ;;  %v1540_v11 = vmov (!%p937_p6), 0.0|0.0   ;;  %vm1541_vm0 = vmmov (!%p937_p6), 0   ;;  %v1542_v14 = vmov (!%p937_p6), 0.0  }
  0xa1   : > { %379 = sbr.rel (%p937_p6) target bundleno = 1440 (0x5a0), region = 64  ;;  %1115 = vmatprep.subr.bf16.mxu0 (!%p937_p6), %v1540_v11  ;;  %v1116_v12 = vpack.c.bf16 (!%p937_p6), %v387_v9, %v386_v8  ;;  %v389_v13 = vld [vmem:[#allocation10 + $0x18] sm:$0xff] (!%p937_p6)  ;;  %1077 = vmatprep.mubr.msk.f32.mxu0 (!%p937_p6), %vm1541_vm0, %v1542_v14  ;;  %vm563_vm1 = vcmask (!%p937_p6), 0   ;;  %566 = vst [vmem:[#allocation6] sm:$0x1] (!%p937_p6), %v1542_v14  ;;  %v390_v16 = vld [vmem:[#allocation10 + $0x20] sm:$0xff] (!%p937_p6) }
  0xa2   : > { %565 = vst.msk [vmem:[#allocation5] sm:$0x1] (!%p937_p6), %vm563_vm1, %v1542_v14  ;;  %1139 = vmatprep.subr.bf16.mxu1 (!%p937_p6), %v1540_v11  ;;  %1112 = vmatprep.mubr.msk.f32.mxu1 (!%p937_p6), %vm1541_vm0, %v1542_v14  ;;  %v1119_v15 = vpack.c.bf16 (!%p937_p6), %v389_v13, %v388_v10  ;;  %v391_v17 = vld [vmem:[#allocation10 + $0x28] sm:$0xff] (!%p937_p6)  ;;  %v474_v18 = vld [vmem:[#allocation12] sm:$0xff] (!%p937_p6)  ;;  %v476_v20 = vld [vmem:[#allocation12 + $0x10] sm:$0xff] (!%p937_p6)  ;;  %vm672_vm2 = vcmask (!%p937_p6), 1040384  }
  0xa3   : > { %1117 = vmatpush3.bf16.msra.mxu0 (!%p937_p6), %v1116_v12  ;;  %v475_v19 = vld [vmem:[#allocation12 + $0x8] sm:$0xff] (!%p937_p6)  ;;  %v477_v21 = vld [vmem:[#allocation12 + $0x18] sm:$0xff] (!%p937_p6)  ;;  %v1122_v22 = vpack.c.bf16 (!%p937_p6), %v391_v17, %v390_v16  ;;  %v392_v24 = vld [vmem:[#allocation10 + $0x30] sm:$0xff] (!%p937_p6) }
  0xa4   : > { %1118 = vmatprep.subr.bf16.mxu0 (!%p937_p6), %v1540_v11  ;;  %v1140_v23 = vpack.c.bf16 (!%p937_p6), %v475_v19, %v474_v18  ;;  %v393_v25 = vld [vmem:[#allocation10 + $0x38] sm:$0xff] (!%p937_p6)  ;;  %v1143_v26 = vpack.c.bf16 (!%p937_p6), %v477_v21, %v476_v20  ;;  %v478_v27 = vld [vmem:[#allocation12 + $0x20] sm:$0xff] (!%p937_p6)  ;;  %v479_v28 = vld [vmem:[#allocation12 + $0x28] sm:$0xff] (!%p937_p6) }
  0xa5   : > { %v1125_v29 = vpack.c.bf16 (!%p937_p6), %v393_v25, %v392_v24  ;;  %v394_v30 = vld [vmem:[#allocation10 + $0x40] sm:$0xff] (!%p937_p6)  ;;  %v395_v31 = vld [vmem:[#allocation10 + $0x48] sm:$0xff] (!%p937_p6)  ;;  %v1146_v32 = vpack.c.bf16 (!%p937_p6), %v479_v28, %v478_v27  ;;  %v480_v33 = vld [vmem:[#allocation12 + $0x30] sm:$0xff] (!%p937_p6) }
  0xa6   : > { %1141 = vmatpush3.bf16.msra.mxu1 (!%p937_p6), %v1140_v23  ;;  %v481_v34 = vld [vmem:[#allocation12 + $0x38] sm:$0xff] (!%p937_p6)  ;;  %v1128_v35 = vpack.c.bf16 (!%p937_p6), %v395_v31, %v394_v30  ;;  %v396_v36 = vld [vmem:[#allocation10 + $0x50] sm:$0xff] (!%p937_p6)  ;;  %v482_v39 = vld [vmem:[#allocation12 + $0x40] sm:$0xff] (!%p937_p6) }
  0xa7   : > { %1120 = vmatpush3.bf16.msra.mxu0 (!%p937_p6), %v1119_v15  ;;  %1142 = vmatprep.subr.bf16.mxu1 (!%p937_p6), %v1540_v11  ;;  %v397_v37 = vld [vmem:[#allocation10 + $0x58] sm:$0xff] (!%p937_p6)  ;;  %v1149_v38 = vpack.c.bf16 (!%p937_p6), %v481_v34, %v480_v33  ;;  %v483_v40 = vld [vmem:[#allocation12 + $0x48] sm:$0xff] (!%p937_p6)  ;;  %v398_v42 = vld [vmem:[#allocation10 + $0x60] sm:$0xff] (!%p937_p6) }
  0xa8   : > { %1121 = vmatprep.subr.bf16.mxu0 %v1540_v11  ;;  %v1131_v41 = vpack.c.bf16 %v397_v37, %v396_v36  ;;  %v399_v43 = vld [vmem:[#allocation10 + $0x68] sm:$0xff]  ;;  %v1152_v44 = vpack.c.bf16 %v483_v40, %v482_v39  ;;  %v484_v45 = vld [vmem:[#allocation12 + $0x50] sm:$0xff]  ;;  %v485_v46 = vld [vmem:[#allocation12 + $0x58] sm:$0xff] }
  0xa9   : > { %v1134_v47 = vpack.c.bf16 %v399_v43, %v398_v42  ;;  %v400_v48 = vld [vmem:[#allocation10 + $0x70] sm:$0xff]  ;;  %v401_v49 = vld [vmem:[#allocation10 + $0x78] sm:$0xff]  ;;  %v1155_v50 = vpack.c.bf16 %v485_v46, %v484_v45  ;;  %v486_v51 = vld [vmem:[#allocation12 + $0x60] sm:$0xff] }
  0xaa   : > { %1144 = vmatpush3.bf16.msra.mxu1 %v1143_v26  ;;  %v487_v52 = vld [vmem:[#allocation12 + $0x68] sm:$0xff]  ;;  %v1137_v53 = vpack.c.bf16 %v401_v49, %v400_v48  ;;  %v1846_v54 = vld [vmem:[#allocation2] sm:$0x1]  ;;  %v488_v57 = vld [vmem:[#allocation12 + $0x70] sm:$0xff] }
  0xab   : > { %1123 = vmatpush3.bf16.msra.mxu0 %v1122_v22  ;;  %1145 = vmatprep.subr.bf16.mxu1 %v1540_v11  ;;  %v1158_v55 = vpack.c.bf16 %v487_v52, %v486_v51  ;;  %v385_v56 = vmax.f32 %v1846_v54, 0.0  ;;  %v489_v58 = vld [vmem:[#allocation12 + $0x78] sm:$0xff]  ;;  %v583_v60 = vld [vmem:[%s1787_s12 + $0x80] sm:$0xff]  ;;  %v584_v61 = vld [vmem:[%s1787_s12 + $0x88] sm:$0xff] }
  0xac   : > { %1124 = vmatprep.subr.bf16.mxu0 %v1540_v11  ;;  %v1161_v59 = vpack.c.bf16 %v489_v58, %v488_v57  ;;  %v567_v62 = vld [vmem:[%s1787_s12] sm:$0xff]  ;;  %v1163_v63 = vpack.c.bf16 %v584_v61, %v583_v60  ;;  %v568_v0 = vld [vmem:[%s1787_s12 + $0x8] sm:$0xff]  ;;  %v585_v1 = vld [vmem:[%s1787_s12 + $0x90] sm:$0xff] }
  0xad   : > { %v586_v2 = vld [vmem:[%s1787_s12 + $0x98] sm:$0xff]  ;;  %v1165_v3 = vpack.c.bf16 %v568_v0, %v567_v62  ;;  %v569_v5 = vld [vmem:[%s1787_s12 + $0x10] sm:$0xff]  ;;  %v587_v7 = vld [vmem:[%s1787_s12 + $0xa0] sm:$0xff]  ;;  %v1544_v62 = vmov 0  }
  0xae   : > { %1147 = vmatpush3.bf16.msra.mxu1 %v1146_v32  ;;  %v1167_v4 = vpack.c.bf16 %v586_v2, %v585_v1  ;;  %v570_v6 = vld [vmem:[%s1787_s12 + $0x18] sm:$0xff]  ;;  %v588_v8 = vld [vmem:[%s1787_s12 + $0xa8] sm:$0xff]  ;;  %v589_v13 = vld [vmem:[%s1787_s12 + $0xb0] sm:$0xff]  ;;  %1334 = vset.pattern.permute.xlu0 %v1544_v62  ;;  %v687_v2 = vlaneseq }
  0xaf   : > { %1126 = vmatpush3.bf16.msra.mxu0 %v1125_v29  ;;  %1148 = vmatprep.subr.bf16.mxu1 %v1540_v11  ;;  %v1169_v9 = vpack.c.bf16 %v570_v6, %v569_v5  ;;  %v1171_v10 = vpack.c.bf16 %v588_v8, %v587_v7  ;;  %v572_v12 = vld [vmem:[%s1787_s12 + $0x28] sm:$0xff]  ;;  %v590_v14 = vld [vmem:[%s1787_s12 + $0xb8] sm:$0xff]  ;;  %v573_v17 = vld [vmem:[%s1787_s12 + $0x30] sm:$0xff] }
  0xb0   : > { %1127 = vmatprep.subr.bf16.mxu0 %v1540_v11  ;;  %v1175_v16 = vpack.c.bf16 %v590_v14, %v589_v13  ;;  %v574_v18 = vld [vmem:[%s1787_s12 + $0x38] sm:$0xff]  ;;  %v591_v19 = vld [vmem:[%s1787_s12 + $0xc0] sm:$0xff]  ;;  %v592_v20 = vld [vmem:[%s1787_s12 + $0xc8] sm:$0xff]  ;;  %1335 = vset.pattern.permute.xlu1 %v1544_v62 }
  0xb1   : > { %v1177_v21 = vpack.c.bf16 %v574_v18, %v573_v17  ;;  %v1179_v22 = vpack.c.bf16 %v592_v20, %v591_v19  ;;  %v575_v23 = vld [vmem:[%s1787_s12 + $0x40] sm:$0xff]  ;;  %v576_v24 = vld [vmem:[%s1787_s12 + $0x48] sm:$0xff]  ;;  %v593_v25 = vld [vmem:[%s1787_s12 + $0xd0] sm:$0xff] }
  0xb2   : > { %1150 = vmatpush3.bf16.msra.mxu1 %v1149_v38  ;;  %v594_v26 = vld [vmem:[%s1787_s12 + $0xd8] sm:$0xff]  ;;  %v1181_v27 = vpack.c.bf16 %v576_v24, %v575_v23  ;;  %v577_v29 = vld [vmem:[%s1787_s12 + $0x50] sm:$0xff]  ;;  %v595_v31 = vld [vmem:[%s1787_s12 + $0xe0] sm:$0xff] }
  0xb3   : > { %1129 = vmatpush3.bf16.msra.mxu0 %v1128_v35  ;;  %1151 = vmatprep.subr.bf16.mxu1 %v1540_v11  ;;  %v1183_v28 = vpack.c.bf16 %v594_v26, %v593_v25  ;;  %v578_v30 = vld [vmem:[%s1787_s12 + $0x58] sm:$0xff]  ;;  %v596_v32 = vld [vmem:[%s1787_s12 + $0xe8] sm:$0xff]  ;;  %v579_v35 = vld [vmem:[%s1787_s12 + $0x60] sm:$0xff] }
  0xb4   : > { %1130 = vmatprep.subr.bf16.mxu0 %v1540_v11  ;;  %v1185_v33 = vpack.c.bf16 %v578_v30, %v577_v29  ;;  %v1187_v34 = vpack.c.bf16 %v596_v32, %v595_v31  ;;  %v580_v36 = vld [vmem:[%s1787_s12 + $0x68] sm:$0xff]  ;;  %v402_v38 = vld [vmem:[%s1956_s2] sm:$0x1]  ;;  %v597_v43 = vld [vmem:[%s1787_s12 + $0xf0] sm:$0xff] }
  0xb5   : > { %v1189_v37 = vpack.c.bf16 %v580_v36, %v579_v35  ;;  %v581_v46 = vld [vmem:[%s1787_s12 + $0x70] sm:$0xff]  ;;  %v490_v49 = vld [vmem:[%s1958_s4] sm:$0x1]  ;;  %v697_v18 = vld [vmem:[#allocation5] sm:$0x1] }
  0xb6   : > { %1153 = vmatpush3.bf16.msra.mxu1 %v1152_v44  ;;  %v598_v44 = vld [vmem:[%s1787_s12 + $0xf8] sm:$0xff] }
  0xb7   : > { %1132 = vmatpush3.bf16.msra.mxu0 %v1131_v41  ;;  %1154 = vmatprep.subr.bf16.mxu1 %v1540_v11  ;;  %v1191_v45 = vpack.c.bf16 %v598_v44, %v597_v43  ;;  %v707_v25 = vld [vmem:[#allocation6] sm:$0x1] }
  0xb8   : > { %1133 = vmatprep.subr.bf16.mxu0 %v1540_v11 }
  0xba   : > { %1156 = vmatpush3.bf16.msra.mxu1 %v1155_v50 }
  0xbb   : > { %1135 = vmatpush3.bf16.msra.mxu0 %v1134_v47  ;;  %1157 = vmatprep.subr.bf16.mxu1 %v1540_v11  ;;  %v582_v47 = vld [vmem:[%s1787_s12 + $0x78] sm:$0xff] }
  0xbc   : > { %1136 = vmatprep.subr.bf16.mxu0 %v1540_v11  ;;  %v1193_v48 = vpack.c.bf16 %v582_v47, %v581_v46 }
  0xbe   : > { %1159 = vmatpush3.bf16.msra.mxu1 %v1158_v55 }
  0xbf   : > { %1138 = vmatpush3.bf16.msra.mxu0 %v1137_v53  ;;  %1160 = vmatprep.subr.bf16.mxu1 %v1540_v11  ;;  %v571_v11 = vld [vmem:[%s1787_s12 + $0x20] sm:$0xff] }
  0xc0   : > { %1164 = vmatprep.subr.bf16.mxu0 %v1163_v63  ;;  %v1173_v15 = vpack.c.bf16 %v572_v12, %v571_v11 }
  0xc2   : > { %1078 = vmatmul.mubr.f32.vlgmr.msra.gmra.mrb[0].mxu0 %v385_v56  ;;  %1162 = vmatpush3.bf16.msra.mxu1 %v1161_v59  ;;  %v1543_v56 = vmov -inf  }
  0xc3   : > { %1196 = vmatprep.subr.bf16.mxu1 %v1163_v63  ;;  %564 = vst.msk [vmem:[#allocation4] sm:$0x1] %vm563_vm1, %v1543_v56 }
  0xc8   : > { %1166 = vmatpush3.bf16.xpose.msra.mxu0 %v1165_v3 }
  0xc9   : > { %1168 = vmatprep.subr.bf16.mxu0 %v1167_v4 }
  0xd0   : > { %1170 = vmatpush3.bf16.xpose.msra.mxu0 %v1169_v9 }
  0xd1   : > { %1172 = vmatprep.subr.bf16.mxu0 %v1171_v10 }
  0xd8   : > { %1174 = vmatpush3.bf16.xpose.msra.mxu0 %v1173_v15 }
  0xd9   : > { %1176 = vmatprep.subr.bf16.mxu0 %v1175_v16 }
  0xe0   : > { %1178 = vmatpush3.bf16.xpose.msra.mxu0 %v1177_v21 }
  0xe1   : > { %1180 = vmatprep.subr.bf16.mxu0 %v1179_v22 }
  0xe8   : > { %1182 = vmatpush3.bf16.xpose.msra.mxu0 %v1181_v27 }
  0xe9   : > { %1184 = vmatprep.subr.bf16.mxu0 %v1183_v28 }
  0xf0   : > { %1186 = vmatpush3.bf16.xpose.msra.mxu0 %v1185_v33 }
  0xf1   : > { %1188 = vmatprep.subr.bf16.mxu0 %v1187_v34 }
  0xf8   : > { %1190 = vmatpush3.bf16.xpose.msra.mxu0 %v1189_v37 }
  0xf9   : > { %1192 = vmatprep.subr.bf16.mxu0 %v1191_v45 }
 0x100   : > { %1194 = vmatpush3.bf16.xpose.msra.mxu0 %v1193_v48 }
 0x195   : > { %v469_v39 = vpop.f32.mrb[0].mxu0 }
 0x196   : > { %v470_v40 = vadd.f32 %v469_v39, %v402_v38  ;;  %v1079_v41 = vpop.f32.mrb[1].mxu0 }
 0x198   : > { %v473_v42 = vmax.f32 %v470_v40, 0.0 }
 0x19a   : > { %1113 = vmatmul.mubr.f32.vlgmr.msra.gmra.mrb[0].mxu1 %v473_v42 }
 0x19b   : > { %1198 = vmatpush3.bf16.msra.mxu1 %v1165_v3  ;;  %v688_v3 = vshrl.u32 %v687_v2, 7 }
 0x19c   : > { %1200 = vmatprep.subr.bf16.mxu1 %v1167_v4 }
 0x19d   : > { %v689_v4 = vsub.s32 0, %v688_v3 }
 0x19f   : > { %1202 = vmatpush3.bf16.msra.mxu1 %v1169_v9 }
 0x1a0   : > { %1204 = vmatprep.subr.bf16.mxu1 %v1171_v10 }
 0x1a3   : > { %1206 = vmatpush3.bf16.msra.mxu1 %v1173_v15 }
 0x1a4   : > { %1208 = vmatprep.subr.bf16.mxu1 %v1175_v16 }
 0x1a7   : > { %1210 = vmatpush3.bf16.msra.mxu1 %v1177_v21 }
 0x1a8   : > { %1212 = vmatprep.subr.bf16.mxu1 %v1179_v22 }
 0x1ab   : > { %1214 = vmatpush3.bf16.msra.mxu1 %v1181_v27 }
 0x1ac   : > { %1216 = vmatprep.subr.bf16.mxu1 %v1183_v28 }
 0x1af   : > { %1218 = vmatpush3.bf16.msra.mxu1 %v1185_v33 }
 0x1b0   : > { %1220 = vmatprep.subr.bf16.mxu1 %v1187_v34 }
 0x1b3   : > { %1222 = vmatpush3.bf16.msra.mxu1 %v1189_v37 }
 0x1b4   : > { %1224 = vmatprep.subr.bf16.mxu1 %v1191_v45 }
 0x1b7   : > { %1226 = vmatpush3.bf16.msra.mxu1 %v1193_v48 }
 0x26d   : > { %v557_v50 = vpop.f32.mrb[0].mxu1 }
 0x26e   : > { %v558_v51 = vadd.f32 %v557_v50, %v490_v49  ;;  %v1114_v52 = vpop.f32.mrb[1].mxu1 }
 0x270   : > { %v561_v53 = vadd.f32 %v558_v51, %v1846_v54  ;;  %v671_v54 = vld [vmem:[#allocation4] sm:$0x1] }
 0x272   : > { %562 = vst [vmem:[#allocation3] sm:$0x1] %v561_v53 }
 0x279   : > { %v599_v55 = vld [vmem:[#allocation3] sm:$0x1] }
 0x27a   : > { %1008 = vmatprep.mubr.f32.mxu0 %v599_v55 }
 0x27b   : > { %1009 = vmatmul.mubr.f32.vlgmr.msra.gmra.mrb[2].mxu0 %v599_v55 }
 0x34e   : > { %v666_v57 = vpop.f32.mrb[2].mxu0 }
 0x34f   : > { %v668_v58 = vpop.f32.mrb[3].mxu0  ;;  %v673_v59 = vsel %vm672_vm2, %v666_v57, -inf }
 0x350   : > { %v674_v60 = vsel %vm672_vm2, %v668_v58, -inf }
 0x351   : > { %v675_v61 = vmax.f32 %v673_v59, %v674_v60 }
 0x353   : > { %676 = vmax.xlane.f32.xlu0 %v675_v61 }
 0x3e0   : > { %v677_v63 = vpop.xlane.xlu0 %676 }
 0x3e1   : > { %v678_v0 = vmax.f32 %v671_v54, %v677_v63 }
 0x3e3   : > { %v679_v1 = vsub.f32 %v671_v54, %v678_v0  ;;  %790 = vst.msk [vmem:[#allocation4] sm:$0x1] %vm563_vm1, %v678_v0  ;;  %684 = vperm.xlu0 %1334, %v678_v0  }
 0x3e5   : > { %v680_v16 = vmul.f32 1.442695, %v679_v1 }
 0x462   : > { %v685_v5 = vpop.permute.xlu0 %684 }
 0x463   : > { %v690_v6 = vrot.slane %v685_v5, %v689_v4 }
 0x465   : > { %v691_v7 = vsub.f32 %v666_v57, %v690_v6  ;;  %v692_v8 = vsub.f32 %v668_v58, %v690_v6 }
 0x467   : > { %v693_v9 = vmul.f32 1.442695, %v691_v7  ;;  %v695_v10 = vmul.f32 1.442695, %v692_v8 }
 0x469   : > { %1336 = vpow2.f32 %v693_v9 }
 0x46a   : > { %1338 = vpow2.f32 %v695_v10 }
 0x46b   : > { %1340 = vpow2.f32 %v680_v16 }
 0x473   : > { %v1337_v11 = vpop.eup %1336 }
 0x474   : > { %v1339_v12 = vpop.eup %1338  ;;  %v699_v13 = vsel %vm672_vm2, %v1337_v11, 0.0 }
 0x475   : > { %782 = vmatprep.mubr.f32.mxu1 %v1339_v12  ;;  %v700_v14 = vsel %vm672_vm2, %v1339_v12, 0.0  ;;  %v1341_v17 = vpop.eup %1340 }
 0x476   : > { %783 = vmatmul.mubr.f32.vlgmr.msra.gmra.mrb[2].mxu1 %v1337_v11  ;;  %v701_v15 = vadd.f32 %v700_v14, %v699_v13  ;;  %v698_v19 = vmul.f32 %v1341_v17, %v697_v18 }
 0x478   : > { %702 = vadd.xlane.f32.xlu1 %v701_v15 }
 0x489   : > { %710 = vperm.xlu1 %1335, %v1341_v17  }
 0x505   : > { %v703_v20 = vpop.xlane.xlu1 %702 }
 0x506   : > { %v704_v21 = vadd.f32 %v703_v20, %v698_v19 }
 0x508   : > { %706 = vst.msk [vmem:[#allocation5] sm:$0x1] %vm563_vm1, %v704_v21 }
 0x509   : > { %v711_v23 = vpop.permute.xlu1 %710 }
 0x50a   : > { %v716_v24 = vrot.slane %v711_v23, %v689_v4 }
 0x50c   : > { %v717_v28 = vmul.f32 %v716_v24, %v707_v25 }
 0x50f   : > { %v795_v22 = vld [vmem:[#allocation5] sm:$0x1] }
 0x510   : > { %798 = vperm.xlu1 %1335, %v795_v22  }
 0x549   : > { %v1042_v26 = vpop.f32.mrb[2].mxu1 }
 0x54a   : > { %v1043_v27 = vpop.f32.mrb[3].mxu1 }
 0x54b   : > { %v1044_v29 = vadd.f32 %v1043_v27, %v1042_v26 }
 0x54d   : > { %v788_v30 = vadd.f32 %v1044_v29, %v717_v28 }
 0x54f   : > { %789 = vst [vmem:[#allocation6] sm:$0x1] %v788_v30 }
 0x556   : > { %v794_v34 = vld [vmem:[#allocation6] sm:$0x1] }
 0x58f   : > { %v799_v31 = vpop.permute.xlu1 %798 }
 0x590   : > { %v804_v32 = vrot.slane %v799_v31, %v689_v4 }
 0x592   : > { %1342 = vrcp.f32 %v804_v32 }
 0x59c   : > { %v1343_v33 = vpop.eup %1342 }
 0x59d   : > { %v806_v35 = vmul.f32 %v1343_v33, %v794_v34 }
 0x59f   : > { %807 = vst [vmem:[%s293_s7] sm:$0x1] %v806_v35 }
 0x5a0 PF: > { %s938_s13 = sshll.u32 %s1520_s22, 4  ;;  %s821_s27 = sshll.u32 %s293_s7, 4  ;;  %s822_s27 = int_to_ptr.vmem [resolvable:$true] %s821_s27 }
 0x5a1   : > { %s1904_s16 = scalar_lea.hbm %s1959_s5, %s938_s13  ;;  %s809_s26 = scalar_lea.sflag [#allocation9], %s1783_s18 }
 0x5a2   : > { %s1430_s9 = scalar_lea.vmem %s822_s27, 16  ;;  %s1545_s29 = smov [#allocation13]  }
 0x5a3   : > { %p1431_p10 = scmp.ne.s32.totalorder %s822_s27, %s1430_s9  ;;  %s1434_s15 = sshll.u32 %s1545_s29, 4  ;;  %s1435_s15 = int_to_ptr.vmem [resolvable:$false] %s1434_s15 }
 0x5a4   : > { %s1436_s12 = scalar_lea.vmem %s1435_s15, 32  ;;  %p1437_p3 = scmp.lt.s32.totalorder %s822_s27, %s1435_s15 }
 0x5a5   : > { %p1432_p11 = pnand %p1431_p10, %p1722_p8  ;;  %p1438_p7 = scmp.lt.s32.totalorder %s1436_s12, %s1430_s9 }
 0x5a7   : > { %p1433_p13 = pneg %p1432_p11  ;;  %p1439_p12 = por %p1438_p7, %p1437_p3 }
 0x5a9   : > { %p1440_p1 = pnand %p1439_p12, %p1433_p13 }
 0x5ab   : > { %1443 = shalt.err (!%p1440_p1)
}
 0x5ac   : > { %s1444_s22 = scalar_lea.hbm %s1904_s16, 16  ;;  %s1448_s21 = scalar_lea.hbm %s1959_s5, 32 }
 0x5ad   : > { %p1445_p2 = scmp.ne.s32.totalorder %s1904_s16, %s1444_s22  ;;  %p1449_p0 = scmp.lt.u32.totalorder %s1904_s16, %s1959_s5 }
 0x5ae   : > { %p1450_p4 = scmp.lt.u32.totalorder %s1448_s21, %s1444_s22  ;;  %p1452_p10 = scmp.lt.u32.totalorder %s1444_s22, %s1904_s16 }
 0x5af   : > { %p1446_p5 = pnand %p1445_p2, %p1722_p8 }
 0x5b0   : > { %p1451_p6 = por %p1450_p4, %p1449_p0 }
 0x5b1   : > { %p1447_p9 = pneg %p1446_p5 }
 0x5b2   : > { %p1453_p11 = por %p1452_p10, %p1451_p6 }
 0x5b4   : > { %p1454_p13 = pnand %p1453_p11, %p1447_p9 }
 0x5b6   : > { %1457 = shalt.err (!%p1454_p13)
}
 0x5b7   : > { %1237 = dma.vmem_to_hbm [thread:$0]  (%p1722_p8), %s822_s27, 16, %s1904_s16, %s809_s26  }
 0x5b8 PF: > { %s1987_s11 = sld [smem:[#allocation17_spill]]  ;;  %s1988_s13 = sld [smem:[#allocation18_spill]] }
 0x5b9   : > { %p1259_p3 = scmp.ge.s32.totalorder %s1532_s25, 2 }
 0x5be   : > { %s833_s6 = sand.u32 1, %s1987_s11   ;;  %p1989_p7 = scmp.ne.s32.totalorder %s1988_s13, 0 }
 0x5bf   : > { %s834_s8 = scalar_lea.sflag [#allocation9], %s833_s6 }
 0x5c0   : > { %p1251_p12 = pnand %p1259_p3, %p1989_p7 }
 0x5c2   : > { %1499 = dma.done.wait (!%p1251_p12), %s834_s8, 16  }
 0x5c3   : > { %1501 = vsyncadd (!%p1251_p12), %s834_s8, 4294967280  ;;  %s22_s25 = sadd.s32 1, %s1532_s25   ;;  %s1990_s18 = smov %s1508_s19 }
 0x5c4   : > { %p19_p1 = scmp.ge.s32.totalorder %s22_s25, 6   ;;  %s1991_s19 = smov %s1512_s20 }
 0x5c5   : > { %s1992_s20 = smov %s1745_s1  ;;  %s1993_s21 = smov %s1524_s23 }
 0x5c6   : > { %s1994_s22 = smov %s1528_s24  ;;  %s1995_s23 = smov %s1998_s10 }
 0x5c7   : > { %s1996_s24 = smov %s2002_s14  ;;  %21 = sbr.rel (!%p19_p1) target bundleno = 10 (0xa), region = 113 }
 0x5ce   :  { %838 = vsyncpa [#allocation8], 1 }
 0x5cf   :  { %840 = vsyncpa [#allocation8 + $0x1], 1 }
 0x5d0   :  { %841 = vsyncpa [#allocation11], 1 }
 0x5d1   :  { %842 = vsyncpa [#allocation9], 1 }
 0x5d2   :  { %844 = vsyncpa [#allocation9 + $0x1], 1 }

</bundles_post_ra>
